<compile_context>
chip_gen: v6e
topology: v6e:2x2x1
jax: 0.10.0
libtpu: 0.0.40
codegen_flags: <defaults>
</compile_context>

<pallas_src>
from typing import NamedTuple, Optional

import jax
import jax.numpy as jnp
from jax.experimental import pallas as pl
from jax.experimental.pallas import tpu as pltpu


_K_SINGLE_TILE_CAP = 2048   # contractions up to this stay a single full-K block
_TM_CAP = 512
_TN_CAP = 512
_TK_CAP = 2048


def _round_up(x: int, m: int) -> int:
    return ((x + m - 1) // m) * m


def _pick_tile(padded_dim: int, cap: int, align: int) -> int:
    """Largest multiple of `align` that divides `padded_dim` and is <= cap."""
    t = min(cap, padded_dim)
    t -= t % align
    while padded_dim % t != 0:
        t -= align
    return t


def _sublane_align(*dtypes) -> int:
    # sublane multiple: 8 for 32-bit, 16 for bf16, 32 for 8-bit
    return max(max(8, 32 // jnp.dtype(d).itemsize) for d in dtypes)


class DenseParams(NamedTuple):
    w_t: jax.Array       # [k_pad, n_pad]  transposed + padded weight (compute dtype)
    bias2d: jax.Array    # [1, n_pad]      f32 bias row (zeros if bias disabled)
    in_features: int
    out_features: int


def prepare_dense_params(weight, bias=None, *, compute_dtype=None) -> DenseParams:
    """One-time parameter prep (amortized across calls).

    weight: [out_features, in_features]  (PyTorch nn.Linear layout)
    bias:   [out_features] or None
    compute_dtype: dtype fed to the MXU (e.g. jnp.bfloat16); default = weight dtype.
    """
    out_features, in_features = weight.shape
    compute_dtype = jnp.dtype(compute_dtype if compute_dtype is not None else weight.dtype)

    sub = _sublane_align(compute_dtype)
    if in_features > _K_SINGLE_TILE_CAP:
        k_pad = _round_up(in_features, 128)     # K will be tiled (128-aligned tiles)
    else:
        k_pad = _round_up(in_features, sub)     # single full-K block; no 128 round-up
    n_pad = _round_up(out_features, 128)        # lane-dense output columns

    w_t = weight.T                              # [in, out] -> plain [tk,tn] RHS for the MXU
    if (k_pad, n_pad) != (in_features, out_features):
        w_t = jnp.pad(w_t, ((0, k_pad - in_features), (0, n_pad - out_features)))
    w_t = w_t.astype(compute_dtype)

    if bias is None:
        b = jnp.zeros((out_features,), jnp.float32)
    else:
        b = bias.astype(jnp.float32)
    if n_pad != out_features:
        b = jnp.pad(b, (0, n_pad - out_features))
    bias2d = b.reshape(1, n_pad)

    return DenseParams(w_t=w_t, bias2d=bias2d,
                       in_features=in_features, out_features=out_features)


# ----------------------------- kernels --------------------------------------


def _dense_tanh_kernel_f32out(x_ref, w_ref, b_ref, o_ref):
    """Tiled kernel, f32 output: accumulate directly into the resident o block."""
    k = pl.program_id(2)

    @pl.when(k == 0)
    def _init():
        o_ref[...] = jnp.broadcast_to(b_ref[...], o_ref.shape)

    o_ref[...] += jnp.dot(x_ref[...], w_ref[...],
                          preferred_element_type=jnp.float32)

    @pl.when(k == pl.num_programs(2) - 1)
    def _finalize():
        o_ref[...] = jnp.tanh(o_ref[...])


def _dense_tanh_kernel_acc(x_ref, w_ref, b_ref, o_ref, acc_ref):
    """Tiled kernel, low-precision output: f32 VMEM accumulator."""
    k = pl.program_id(2)

    @pl.when(k == 0)
    def _init():
        acc_ref[...] = jnp.broadcast_to(b_ref[...], acc_ref.shape)

    acc_ref[...] += jnp.dot(x_ref[...], w_ref[...],
                            preferred_element_type=jnp.float32)

    @pl.when(k == pl.num_programs(2) - 1)
    def _finalize():
        o_ref[...] = jnp.tanh(acc_ref[...]).astype(o_ref.dtype)


def _dense_tanh_kernel_whole(x_ref, w_ref, b_ref, o_ref):
    """Gridless fast path: whole (small) arrays resident in VMEM."""
    y = jnp.dot(x_ref[...], w_ref[...], preferred_element_type=jnp.float32)
    o_ref[...] = jnp.tanh(y + b_ref[...]).astype(o_ref.dtype)


# ----------------------------- wrapper ---------------------------------------


def dense_forward(x, params: DenseParams):
    """x: [bs, in_features]; params from prepare_dense_params."""
    w_t, bias2d, in_features, out_features = params
    bs, k_in = x.shape
    assert k_in == in_features
    k_pad, n_pad = w_t.shape
    out_dtype = x.dtype
    compute_dtype = w_t.dtype

    # Per-call input prep touches only x (weight/bias were prepared once).
    if k_pad != in_features:
        x = jnp.pad(x, ((0, 0), (0, k_pad - in_features)))
    if x.dtype != compute_dtype:
        x = x.astype(compute_dtype)

    # Tile plan: divisor-exact, lane/sublane aligned tiles.
    m_align = _sublane_align(compute_dtype, out_dtype)
    m_pad = _round_up(bs, m_align)
    tm = _pick_tile(m_pad, _TM_CAP, m_align)
    tn = _pick_tile(n_pad, _TN_CAP, 128)
    tk = _pick_tile(k_pad, _TK_CAP, 128) if k_pad % 128 == 0 else k_pad

    # v7x: make sure both TensorCores get work when the M/N grid collapses.
    if (m_pad // tm) * (n_pad // tn) == 1:
        if n_pad >= 256 and (n_pad // 2) % 128 == 0:
            tn = n_pad // 2
        elif m_pad >= 2 * m_align and (m_pad // 2) % m_align == 0:
            tm = m_pad // 2

    gm, gn, gk = m_pad // tm, n_pad // tn, k_pad // tk

    if gm == 1 and gn == 1 and gk == 1:
        # Tiny problem: single gridless kernel, everything resident in VMEM,
        # no pipeline setup, no M padding (worst case ~9 MiB with the caps above).
        out = pl.pallas_call(
            _dense_tanh_kernel_whole,
            out_shape=jax.ShapeDtypeStruct((bs, n_pad), out_dtype),
            in_specs=[pl.BlockSpec(memory_space=pltpu.MemorySpace.VMEM)] * 3,
            out_specs=pl.BlockSpec(memory_space=pltpu.MemorySpace.VMEM),
            compiler_params=pltpu.CompilerParams(
                vmem_limit_bytes=32 * 1024 * 1024),
        )(x, w_t, bias2d)
        return out[:, :out_features] if n_pad != out_features else out

    if m_pad != bs:
        x = jnp.pad(x, ((0, m_pad - bs), (0, 0)))

    use_scratch = jnp.dtype(out_dtype) != jnp.dtype(jnp.float32)
    kernel = _dense_tanh_kernel_acc if use_scratch else _dense_tanh_kernel_f32out
    scratch = [pltpu.VMEM((tm, tn), jnp.float32)] if use_scratch else []

    in_bytes = jnp.dtype(compute_dtype).itemsize
    out_bytes = jnp.dtype(out_dtype).itemsize
    vmem_est = (2 * (tm * tk + tk * tn) * in_bytes + 2 * tn * 4
                + 2 * tm * tn * out_bytes
                + (tm * tn * 4 if use_scratch else 0))
    vmem_limit = int(min(max(2 * vmem_est, 32 * 1024 * 1024), 64 * 1024 * 1024))

    out = pl.pallas_call(
        kernel,
        out_shape=jax.ShapeDtypeStruct((m_pad, n_pad), out_dtype),
        grid_spec=pltpu.PrefetchScalarGridSpec(
            num_scalar_prefetch=0,
            grid=(gm, gn, gk),
            in_specs=[
                pl.BlockSpec((tm, tk), lambda i, j, k: (i, k)),   # x tile
                pl.BlockSpec((tk, tn), lambda i, j, k: (k, j)),   # W^T tile [in, out]
                pl.BlockSpec((1, tn), lambda i, j, k: (0, j)),    # bias tile
            ],
            out_specs=pl.BlockSpec((tm, tn), lambda i, j, k: (i, j)),
            scratch_shapes=scratch,
        ),
        compiler_params=pltpu.CompilerParams(
            dimension_semantics=("parallel", "parallel", "arbitrary"),
            vmem_limit_bytes=vmem_limit),
    )(x, w_t, bias2d)

    if (m_pad, n_pad) != (bs, out_features):
        out = out[:bs, :out_features]
    return out


if __name__ == "__main__":
    key = jax.random.PRNGKey(0)

    # --- Tiny shape consistent with the module: batch=8, in=32, out=64 -------
    bs, in_features, out_features = 8, 32, 64
    kx, kw, kb = jax.random.split(key, 3)
    x = jax.random.normal(kx, (bs, in_features), dtype=jnp.float32)
    weight = jax.random.normal(kw, (out_features, in_features), dtype=jnp.float32) * 0.1
    bias = jax.random.normal(kb, (out_features,), dtype=jnp.float32) * 0.1

    # One-time parameter prep (amortized), then the features-dict forward.
    # TODO(synk): get_config_dict()/load() are host-side serialization helpers
    # and the generic activation_function hook is Tanh-only here; not kernel ops.
    params = prepare_dense_params(weight, bias)
    features = {"semantics_embedding": x}
    features["semantics_embedding"] = dense_forward(features["semantics_embedding"], params)
    out = jax.block_until_ready(features["semantics_embedding"])

    ref = jnp.tanh(x @ weight.T + bias)
    assert out.shape == (bs, out_features)
    assert jnp.allclose(out, ref, atol=1e-4, rtol=1e-4), "tiny-shape mismatch"

    # --- Medium, non-aligned shape: exercises N/K padding + output slicing ---
    bs2, in2, out2 = 200, 640, 320
    kx2, kw2, kb2 = jax.random.split(jax.random.PRNGKey(1), 3)
    x2 = jax.random.normal(kx2, (bs2, in2), dtype=jnp.float32)
    w2 = jax.random.normal(kw2, (out2, in2), dtype=jnp.float32) * 0.05
    b2 = jax.random.normal(kb2, (out2,), dtype=jnp.float32) * 0.05
    params2 = prepare_dense_params(w2, b2)
    out2_v = jax.block_until_ready(dense_forward(x2, params2))
    ref2 = jnp.tanh(x2 @ w2.T + b2)
    assert out2_v.shape == (bs2, out2)
    assert jnp.allclose(out2_v, ref2, atol=1e-2, rtol=1e-2), "medium-shape mismatch"

    # --- Large shape: exercises the tiled (M,N,K) grid with K accumulation ---
    bs3, in3, out3 = 256, 4096, 1024
    kx3, kw3, kb3 = jax.random.split(jax.random.PRNGKey(2), 3)
    x3 = jax.random.normal(kx3, (bs3, in3), dtype=jnp.float32)
    w3 = jax.random.normal(kw3, (out3, in3), dtype=jnp.float32) * 0.02
    b3 = jax.random.normal(kb3, (out3,), dtype=jnp.float32) * 0.1
    ref3 = jnp.tanh(x3 @ w3.T + b3)

    params3 = prepare_dense_params(w3, b3)
    out3_v = jax.block_until_ready(dense_forward(x3, params3))
    assert out3_v.shape == (bs3, out3)
    assert jnp.allclose(out3_v, ref3, atol=1e-2, rtol=1e-2), "grid-path mismatch"

    # --- Same shape, bf16 compute path (f32 accumulation + f32 output) -------
    params3_bf16 = prepare_dense_params(w3, b3, compute_dtype=jnp.bfloat16)
    out3_bf16 = jax.block_until_ready(dense_forward(x3, params3_bf16))
    assert out3_bf16.shape == (bs3, out3)
    assert out3_bf16.dtype == jnp.float32
    assert jnp.allclose(out3_bf16, ref3, atol=5e-2, rtol=5e-2), "bf16-path mismatch"

    print("KERNEL_OK")
</pallas_src>

<mosaic_0001>
module attributes {stable_mosaic.version = 11 : i64} {
  func.func @_dense_tanh_kernel_whole(%arg0: memref<8x32xf32, #tpu.memory_space<vmem>>, %arg1: memref<32x128xf32, #tpu.memory_space<vmem>>, %arg2: memref<1x128xf32, #tpu.memory_space<vmem>>, %arg3: memref<8x128xf32, #tpu.memory_space<vmem>>) attributes {dimension_semantics = [], scalar_prefetch = 0 : i64, scratch_operands = 0 : i64, tpu.core_type = #tpu.core_type<tc>} {
    %c0 = arith.constant 0 : index
    %c0_0 = arith.constant 0 : index
    %0 = vector.load %arg0[%c0, %c0_0] : memref<8x32xf32, #tpu.memory_space<vmem>>, vector<8x32xf32>
    %c0_1 = arith.constant 0 : index
    %c0_2 = arith.constant 0 : index
    %1 = vector.load %arg1[%c0_1, %c0_2] : memref<32x128xf32, #tpu.memory_space<vmem>>, vector<32x128xf32>
    %cst = arith.constant dense<0.000000e+00> : vector<8x128xf32>
    %2 = tpu.matmul %0, %1, %cst {dimension_numbers = #tpu.dot_dimension_numbers<[1], [0], [0], [1], [0, 0, 1, 1], [], []>} : vector<8x32xf32>, vector<32x128xf32>, vector<8x128xf32> -> vector<8x128xf32>
    %c0_3 = arith.constant 0 : index
    %c0_4 = arith.constant 0 : index
    %3 = vector.load %arg2[%c0_3, %c0_4] : memref<1x128xf32, #tpu.memory_space<vmem>>, vector<1x128xf32>
    %4 = vector.broadcast %3 : vector<1x128xf32> to vector<8x128xf32>
    %5 = arith.addf %2, %4 : vector<8x128xf32>
    %6 = math.tanh %5 : vector<8x128xf32>
    %c0_5 = arith.constant 0 : index
    %c0_6 = arith.constant 0 : index
    %7 = vector.load %arg3[%c0_5, %c0_6] : memref<8x128xf32, #tpu.memory_space<vmem>>, vector<8x128xf32>
    tpu.vector_store %arg3[%c0_5, %c0_6], %6 {strides = array<i32>} : memref<8x128xf32, #tpu.memory_space<vmem>>, vector<8x128xf32>,
    return
  }
}

</mosaic_0001>

<bundles_post_ra>
// kernel: tpu_custom_call.1
= control target key start
LH: loop header
LB: loop body
LE: loop exit
PB: predicated region body
PF: predicated region fallthrough
CT: control target
= control target key end

     0   :  { %8 = vsyncpa [#allocation3], 0  ;;  %s277_s0 = inlined_call_operand.hbm [shape: f32[8,32], index: 0, kind: input, shape index: {}]   ;;  %s278_s1 = inlined_call_operand.hbm [shape: f32[32,128], index: 1, kind: input, shape index: {}]   ;;  %s279_s2 = inlined_call_operand.vmem [shape: f32[1,128], index: 2, kind: input, shape index: {}]   ;;  %s280_s3 = inlined_call_operand.hbm [shape: f32[8,128], index: 3, kind: output, shape index: {}]  }
   0x1   :  { %9 = vsyncpa [#allocation6], 0 }
   0x2   :  { %10 = vsyncpa [#allocation4], 0  ;;  %s238_s12 = smov [#allocation2]   ;;  %s239_s14 = smov [#allocation5]  }
   0x3   :  { %s17_s13 = sshll.u32 %s238_s12, 4  ;;  %s26_s15 = sshll.u32 %s239_s14, 4  ;;  %s18_s13 = int_to_ptr.vmem [resolvable:$true] %s17_s13  ;;  %s27_s15 = int_to_ptr.vmem [resolvable:$true] %s26_s15 }
   0x4   :  { %s180_s16 = scalar_lea.vmem %s18_s13, 128  ;;  %p185_p1 = scmp.lt.s32.totalorder %s18_s13, %s18_s13 }
   0x5   :  { %p181_p0 = scmp.ne.s32.totalorder %s18_s13, %s180_s16  ;;  %p186_p2 = scmp.lt.s32.totalorder %s180_s16, %s180_s16 }
   0x7   :  { %p187_p3 = por %p186_p2, %p185_p1 }
   0x9   :  { %p188_p4 = pnand %p187_p3, %p181_p0 }
   0xb   :  { %191 = shalt.err (!%p188_p4)
}
   0xc   :  { %20 = dma.hbm_to_vmem [thread:$0]  %s277_s0, 128, %s18_s13, [#allocation3]  }
   0xd   :  { %s200_s19 = scalar_lea.vmem %s27_s15, 512  ;;  %p205_p6 = scmp.lt.s32.totalorder %s27_s15, %s27_s15 }
   0xe   :  { %p201_p5 = scmp.ne.s32.totalorder %s27_s15, %s200_s19  ;;  %p206_p7 = scmp.lt.s32.totalorder %s200_s19, %s200_s19 }
  0x10   :  { %p207_p8 = por %p206_p7, %p205_p6 }
  0x12   :  { %p208_p9 = pnand %p207_p8, %p201_p5 }
  0x14   :  { %211 = shalt.err (!%p208_p9)
}
  0x15   :  { %s240_s20 = smov 128   ;;  %s241_s21 = smov 8  }
  0x16   :  { %32 = dma.hbm_to_vmem [thread:$0]  %s278_s1, 512, %s27_s15, [#allocation6], %s240_s20, %s240_s20, %s241_s21  }
  0x17   :  { %232 = dma.done.wait [#allocation3], 128  }
  0x18   :  { %233 = vsyncadd [#allocation3], 4294967168 }
  0x19   :  { %234 = dma.done.wait [#allocation6], 512  }
  0x1a   :  { %235 = vsyncadd [#allocation6], 4294966784  ;;  %v242_v0 = vmov 0.0   ;;  %vm243_vm0 = vmmov 0   ;;  %v45_v1 = vld [vmem:[#allocation5 + $0x18] sm:$0xff]  ;;  %v44_v2 = vld [vmem:[#allocation5 + $0x10] sm:$0xff] }
  0x1b   :  { %152 = vmatprep.subr.mxu0 %v242_v0  ;;  %160 = vmatprep.mubr.msk.f32.mxu0 %vm243_vm0, %v242_v0  ;;  %v43_v3 = vld [vmem:[#allocation5 + $0x8] sm:$0xff]  ;;  %v42_v4 = vld [vmem:[#allocation5] sm:$0xff]  ;;  %v41_v5 = vld [vmem:[#allocation2] sm:$0xff]  ;;  %vm53_vm1 = vcmask 261120   ;;  %s244_s24 = smov [#allocation7]  }
  0x1c   :  { %153 = vmatpush3.msra.mxu0 %v45_v1  ;;  %v145_v6 = vld [vmem:[%s279_s2] ss:$0 sm:$0xff]  ;;  %s135_s25 = sshll.u32 %s244_s24, 4  ;;  %s136_s25 = int_to_ptr.vmem [resolvable:$true] %s135_s25 }
  0x1d   :  { %154 = vmatprep.subr.mxu0 %v242_v0  ;;  %s212_s26 = scalar_lea.vmem %s136_s25, 128  ;;  %p217_p11 = scmp.lt.s32.totalorder %s136_s25, %s136_s25 }
  0x1e   :  { %155 = vmatpush3.msra.mxu0 %v44_v2  ;;  %p213_p10 = scmp.ne.s32.totalorder %s136_s25, %s212_s26  ;;  %p218_p12 = scmp.lt.s32.totalorder %s212_s26, %s212_s26 }
  0x1f   :  { %156 = vmatprep.subr.mxu0 %v242_v0 }
  0x20   :  { %157 = vmatpush3.msra.mxu0 %v43_v3  ;;  %p219_p13 = por %p218_p12, %p217_p11 }
  0x21   :  { %158 = vmatprep.subr.mxu0 %v242_v0 }
  0x22   :  { %159 = vmatpush3.msra.mxu0 %v42_v4  ;;  %p220_p0 = pnand %p219_p13, %p213_p10 }
  0x23   :  { %161 = vmatmul.mubr.msk.f32.vlgmr.msra.gmra.mxu0 %vm53_vm1, %v41_v5 }
  0xe3   :  { %v123_v7 = vpop.f32.mrf.mxu0 }
  0xe4   :  { %v124_v8 = vadd.f32 %v145_v6, %v123_v7 }
  0xe5   :  { %v162_v9 = vpop.f32.mrf.mxu0 }
  0xe6   :  { %170 = vtanh.f32 %v124_v8 }
  0xf3   :  { %v171_v10 = vpop.eup %170 }
  0xf4   :  { %128 = vst [vmem:[#allocation7] sm:$0xff] %v171_v10 }
  0xf5   :  { %223 = shalt.err (!%p220_p0)
}
  0xf6   :  { %138 = dma.vmem_to_hbm [thread:$0]  %s136_s25, 128, %s280_s3, [#allocation4]  }
  0xf7   :  { %236 = dma.done.wait [#allocation4], 128  }
  0xf8   :  { %237 = vsyncadd [#allocation4], 4294967168 }
  0xf9   :  { %142 = vsyncpa [#allocation3], 1 }
  0xfa   :  { %143 = vsyncpa [#allocation6], 1 }
  0xfb   :  { %144 = vsyncpa [#allocation4], 1 }

</bundles_post_ra>
